<compile_context>
chip_gen: v5e
topology: v5e:2x2
jax: 0.10.0
libtpu: 0.0.40
codegen_flags: <defaults>
</compile_context>

<pallas_src>
import math

import numpy as np
import jax
import jax.numpy as jnp
from jax.experimental import pallas as pl
from jax.experimental.pallas import tpu as pltpu


# TODO(synk): exact sigpy `dce.arterial_input_function` is not available here;
# use a deterministic Tofts/Weinmann bi-exponential population AIF instead.
def arterial_input_function(sample_time):
    t = np.asarray(np.squeeze(sample_time), dtype=np.float32)
    D, a1, a2, m1, m2 = 0.1, 3.99, 4.78, 0.144, 0.0111
    cp = D * (a1 * np.exp(-m1 * t) + a2 * np.exp(-m2 * t))
    return np.where(t > 0.0, cp, 0.0).astype(np.float32)


def _round_up(a, b):
    return ((a + b - 1) // b) * b


def _make_dce_kernel(TR, R1, R1CA, M0_trans, cos_FA, M_steady, m00, m01):
    # Fold -TR*(R1 + R1CA*CA) into a single FMA: a + b*CA.
    a = float(-TR * R1)
    b = float(-TR * R1CA)
    M0_trans = float(M0_trans)
    cos_FA = float(cos_FA)
    M_steady = float(M_steady)
    m00 = float(m00)   # K_time[0]
    m01 = float(m01)   # Cp[0]
    # x0 = CA[0] = m00*x1 + m01*x2; identically zero when sample_time[0]==0.
    add_x0 = (m00 != 0.0) or (m01 != 0.0)

    def kernel(k_ref, cp_ref, xr_ref, y_ref):
        x1 = xr_ref[0:1, :]                              # (1, tn)
        x2 = xr_ref[1:2, :]                              # (1, tn)
        # CA = mult @ xr expanded as two broadcast-FMAs (VPU), K == 2.
        CA = k_ref[...] * x1 + cp_ref[...] * x2          # (T, tn) f32
        E1CA = jnp.exp(a + b * CA)                       # EUP
        inv_den = pl.reciprocal(1.0 - cos_FA * E1CA, approx=False)  # EUP recip
        out = (M0_trans * (1.0 - E1CA)) * inv_den - M_steady
        if add_x0:
            out = out + (m00 * x1 + m01 * x2)
        y_ref[...] = out.astype(y_ref.dtype)

    return kernel


def dce_forward(x, sample_time, R1=1.0, M0=5.0, R1CA=4.39, FA=15.0, TR=0.006,
                tn=2048, out_dtype=jnp.float32):
    """Pallas implementation of DCE.forward.

    x:           (2, *spatial) float32 kinetic-parameter maps.
    sample_time: (T,) float32 sample times (minutes); needs >= 2 nonzero times.
    tn:          lane tile (multiple of 128); auto-capped / padded as needed.
    out_dtype:   jnp.float32 (default) or jnp.bfloat16 to halve write-back.
    returns:     (T, *spatial) signal.
    """
    ishape = tuple(x.shape)
    assert ishape[0] == 2, "first axis of x must hold the 2 kinetic params"
    N = int(np.prod(ishape[1:]))

    st = np.asarray(np.squeeze(sample_time), dtype=np.float32)
    T = int(st.shape[0])

    # ---- parameter setup (mirrors nn.Module.__init__), plain numpy glue ----
    FA_rad = FA * math.pi / 180.0
    M0_trans = M0 * math.sin(FA_rad)
    E1 = math.exp(-TR * R1)
    M_steady = M0_trans * (1.0 - E1) / (1.0 - E1 * math.cos(FA_rad))

    Cp = arterial_input_function(st)                      # (T,)
    t1 = st[np.nonzero(st)]
    assert t1.size >= 2, "need at least two nonzero sample times (for dt)"
    dt = np.diff(t1)
    K_time = (np.cumsum(Cp) * dt[-1]).astype(np.float32)  # (T,)

    # ---- tile selection -----------------------------------------------------
    LANE = 128
    n_lane = _round_up(max(N, 1), LANE)
    tn_eff = max(LANE, (min(int(tn), n_lane) // LANE) * LANE)

    # Keep (double-buffered in/out + ~3 fp32 temporaries) under ~12 MiB so the
    # default scoped-VMEM limit is safe on v5e (16 MiB) / v6e / v7x (32 MiB).
    def _vmem_est(t):
        return 4 * t * (2 * 2 + 2 * T + 3 * T)
    while tn_eff > LANE and _vmem_est(tn_eff) > 12 * 1024 * 1024:
        tn_eff = max(LANE, (tn_eff // 2 // LANE) * LANE)

    # Prefer >= 2 grid steps so v7x's two TensorCores can both be used.
    if _round_up(N, tn_eff) // tn_eff < 2 and tn_eff > LANE:
        half = max(LANE, (tn_eff // 2 // LANE) * LANE)
        if _round_up(N, half) // half >= 2:
            tn_eff = half

    N_pad = _round_up(N, tn_eff)

    xr = jnp.asarray(x, dtype=jnp.float32).reshape(2, N)
    if N_pad != N:
        xr = jnp.pad(xr, ((0, 0), (0, N_pad - N)))

    k_col = jnp.asarray(K_time.reshape(T, 1))             # (T, 1)
    cp_col = jnp.asarray(Cp.reshape(T, 1))                 # (T, 1)

    kernel = _make_dce_kernel(TR, R1, R1CA, M0_trans, math.cos(FA_rad),
                              M_steady, K_time[0], Cp[0])

    y = pl.pallas_call(
        kernel,
        out_shape=jax.ShapeDtypeStruct((T, N_pad), out_dtype),
        grid=(N_pad // tn_eff,),
        in_specs=[
            pl.BlockSpec((T, 1), lambda j: (0, 0)),        # K_time column
            pl.BlockSpec((T, 1), lambda j: (0, 0)),        # Cp column
            pl.BlockSpec((2, tn_eff), lambda j: (0, j)),   # params, tiled on N
        ],
        out_specs=pl.BlockSpec((T, tn_eff), lambda j: (0, j)),
        compiler_params=pltpu.CompilerParams(
            dimension_semantics=("parallel",)),
    )(k_col, cp_col, xr)

    if N_pad != N:
        y = y[:, :N]
    return y.reshape((T,) + ishape[1:])


def dce_forward_ref(x, sample_time, R1=1.0, M0=5.0, R1CA=4.39, FA=15.0,
                    TR=0.006):
    """Pure-numpy reference, line-for-line port of the PyTorch forward."""
    x = np.asarray(x, dtype=np.float32)
    st = np.asarray(np.squeeze(sample_time), dtype=np.float32)
    ishape = x.shape
    FA_radian = FA * math.pi / 180.0
    M0_trans = M0 * math.sin(FA_radian)
    E1 = math.exp(-TR * R1)
    M_steady = M0_trans * (1.0 - E1) / (1.0 - E1 * math.cos(FA_radian))
    Cp = arterial_input_function(st)
    t1 = st[np.nonzero(st)]
    dt = np.diff(t1)
    K_time = np.cumsum(Cp) * dt[-1]
    mult = np.stack((K_time, Cp), axis=1)
    xr = x.reshape(ishape[0], -1)
    CA = (mult @ xr).reshape((len(st),) + ishape[1:])
    x0 = CA[0, ...]
    E1CA = np.exp(-TR * (R1 + R1CA * CA))
    CA_trans = M0_trans * (1 - E1CA) / (1 - E1CA * math.cos(FA_radian))
    return CA_trans + x0 - M_steady


if __name__ == "__main__":
    key = jax.random.PRNGKey(0)
    k1, k2 = jax.random.split(key)

    # 8 time points, first at t=0 (excluded by nonzero()/diff), minutes.
    sample_time = np.arange(8, dtype=np.float32) * 0.5

    # Case 1: (2, 16, 16) -> N=256, exercises the >=2-grid-step path.
    x = jnp.abs(jax.random.normal(k1, (2, 16, 16), dtype=jnp.float32)) * 0.1
    y = jax.block_until_ready(dce_forward(x, sample_time))
    y_ref = dce_forward_ref(np.asarray(x), sample_time)
    np.testing.assert_allclose(np.asarray(y), y_ref, rtol=1e-5, atol=1e-5)

    # Case 2: (2, 10, 10) -> N=100, exercises the pad-to-tile path.
    x2 = jnp.abs(jax.random.normal(k2, (2, 10, 10), dtype=jnp.float32)) * 0.1
    y2 = jax.block_until_ready(dce_forward(x2, sample_time))
    y2_ref = dce_forward_ref(np.asarray(x2), sample_time)
    np.testing.assert_allclose(np.asarray(y2), y2_ref, rtol=1e-5, atol=1e-5)

    # Case 3: optional bf16 output (halves HBM write-back); loose tolerance.
    y_bf16 = jax.block_until_ready(
        dce_forward(x, sample_time, out_dtype=jnp.bfloat16))
    np.testing.assert_allclose(np.asarray(y_bf16, dtype=np.float32), y_ref,
                               rtol=2e-2, atol=2e-2)

    print("KERNEL_OK")
</pallas_src>

<mosaic_0001>
module attributes {stable_mosaic.version = 11 : i64} {
  func.func @kernel(%arg0: i32, %arg1: memref<8x1xf32, #tpu.memory_space<vmem>>, %arg2: memref<8x1xf32, #tpu.memory_space<vmem>>, %arg3: memref<2x128xf32, #tpu.memory_space<vmem>>, %arg4: memref<8x128xf32, #tpu.memory_space<vmem>>) attributes {dimension_semantics = [#tpu.dimension_semantics<parallel>], iteration_bounds = array<i64: 2>, scalar_prefetch = 0 : i64, scratch_operands = 0 : i64, tpu.core_type = #tpu.core_type<tc>, window_params = [{pipeline_mode = #tpu.pipeline_mode<synchronous>, transform_indices = @transform_0, window_bounds = array<i64: 8, 1>}, {pipeline_mode = #tpu.pipeline_mode<synchronous>, transform_indices = @transform_1, window_bounds = array<i64: 8, 1>}, {transform_indices = @transform_2, window_bounds = array<i64: 2, 128>}, {transform_indices = @transform_3, window_bounds = array<i64: 8, 128>}]} {
    %c0 = arith.constant 0 : index
    %c0_0 = arith.constant 0 : index
    %0 = vector.load %arg3[%c0, %c0_0] : memref<2x128xf32, #tpu.memory_space<vmem>>, vector<1x128xf32>
    %c1 = arith.constant 1 : index
    %c0_1 = arith.constant 0 : index
    %1 = vector.load %arg3[%c1, %c0_1] : memref<2x128xf32, #tpu.memory_space<vmem>>, vector<1x128xf32>
    %c0_2 = arith.constant 0 : index
    %c0_3 = arith.constant 0 : index
    %2 = vector.load %arg1[%c0_2, %c0_3] : memref<8x1xf32, #tpu.memory_space<vmem>>, vector<8x1xf32>
    %3 = vector.broadcast %2 : vector<8x1xf32> to vector<8x128xf32>
    %4 = vector.broadcast %0 : vector<1x128xf32> to vector<8x128xf32>
    %5 = arith.mulf %3, %4 : vector<8x128xf32>
    %c0_4 = arith.constant 0 : index
    %c0_5 = arith.constant 0 : index
    %6 = vector.load %arg2[%c0_4, %c0_5] : memref<8x1xf32, #tpu.memory_space<vmem>>, vector<8x1xf32>
    %7 = vector.broadcast %6 : vector<8x1xf32> to vector<8x128xf32>
    %8 = vector.broadcast %1 : vector<1x128xf32> to vector<8x128xf32>
    %9 = arith.mulf %7, %8 : vector<8x128xf32>
    %10 = arith.addf %5, %9 : vector<8x128xf32>
    %cst = arith.constant -2.634000e-02 : f32
    %11 = vector.broadcast %cst : f32 to vector<8x128xf32>
    %12 = arith.mulf %11, %10 : vector<8x128xf32>
    %cst_6 = arith.constant -6.000000e-03 : f32
    %13 = vector.broadcast %cst_6 : f32 to vector<8x128xf32>
    %14 = arith.addf %13, %12 : vector<8x128xf32>
    %15 = math.exp %14 : vector<8x128xf32>
    %cst_7 = arith.constant 0.965925812 : f32
    %16 = vector.broadcast %cst_7 : f32 to vector<8x128xf32>
    %17 = arith.mulf %16, %15 : vector<8x128xf32>
    %cst_8 = arith.constant 1.000000e+00 : f32
    %18 = vector.broadcast %cst_8 : f32 to vector<8x128xf32>
    %19 = arith.subf %18, %17 : vector<8x128xf32>
    %20 = tpu.reciprocal %19 : vector<8x128xf32> -> vector<8x128xf32>
    %cst_9 = arith.constant 1.000000e+00 : f32
    %21 = vector.broadcast %cst_9 : f32 to vector<8x128xf32>
    %22 = arith.subf %21, %15 : vector<8x128xf32>
    %cst_10 = arith.constant 1.29409528 : f32
    %23 = vector.broadcast %cst_10 : f32 to vector<8x128xf32>
    %24 = arith.mulf %23, %22 : vector<8x128xf32>
    %25 = arith.mulf %24, %20 : vector<8x128xf32>
    %cst_11 = arith.constant 1.942500e-01 : f32
    %26 = vector.broadcast %cst_11 : f32 to vector<8x128xf32>
    %27 = arith.subf %25, %26 : vector<8x128xf32>
    %c0_12 = arith.constant 0 : index
    %c0_13 = arith.constant 0 : index
    %28 = vector.load %arg4[%c0_12, %c0_13] : memref<8x128xf32, #tpu.memory_space<vmem>>, vector<8x128xf32>
    tpu.vector_store %arg4[%c0_12, %c0_13], %27 {strides = array<i32>} : memref<8x128xf32, #tpu.memory_space<vmem>>, vector<8x128xf32>,
    return
  }
  func.func @transform_0(%arg0: i32) -> (i32, i32) {
    %c0_i32 = arith.constant 0 : i32
    %c0_i32_0 = arith.constant 0 : i32
    %c0_i32_1 = arith.constant 0 : i32
    return %c0_i32, %c0_i32_0 : i32, i32
  }
  func.func @transform_1(%arg0: i32) -> (i32, i32) {
    %c0_i32 = arith.constant 0 : i32
    %c0_i32_0 = arith.constant 0 : i32
    %c0_i32_1 = arith.constant 0 : i32
    return %c0_i32, %c0_i32_0 : i32, i32
  }
  func.func @transform_2(%arg0: i32) -> (i32, i32) {
    %c0_i32 = arith.constant 0 : i32
    %c0_i32_0 = arith.constant 0 : i32
    return %c0_i32, %arg0 : i32, i32
  }
  func.func @transform_3(%arg0: i32) -> (i32, i32) {
    %c0_i32 = arith.constant 0 : i32
    %c0_i32_0 = arith.constant 0 : i32
    return %c0_i32, %arg0 : i32, i32
  }
}

</mosaic_0001>

<bundles_post_ra>
// kernel: tpu_custom_call.1
= control target key start
LH: loop header
LB: loop body
LE: loop exit
PB: predicated region body
PF: predicated region fallthrough
CT: control target
= control target key end

     0   :  { %8 = vsyncpa [#allocation3], 0  ;;  %s519_s0 = inlined_call_operand.vmem [shape: f32[8,1], index: 0, kind: input, shape index: {}]   ;;  %s520_s1 = inlined_call_operand.vmem [shape: f32[8,1], index: 1, kind: input, shape index: {}]   ;;  %s521_s2 = inlined_call_operand.vmem [shape: f32[2,256], index: 2, kind: input, shape index: {}]   ;;  %s522_s3 = inlined_call_operand.hbm [shape: f32[8,256], index: 3, kind: output, shape index: {}]  }
   0x1   :  { %10 = vsyncpa [#allocation3 + $0x1], 0  ;;  %s428_s12 = smov 0   ;;  %s430_s13 = smov 0  }
   0x2   :  { %s432_s14 = smov 0   ;;  %s434_s15 = smov 0  }
   0x3 LB: > { %s449_s16 = sadd.s32 4294967295, %s405_s15   ;;  %s285_s17 = sadd.s32 4294967294, %s405_s15   ;;  %s405_s15 = sphi %s434_s15, %s528_s15   ;;  %s401_s14 = sphi %s432_s14, %s527_s14   ;;  %s397_s13 = sphi %s430_s13, %s526_s13   ;;  %s393_s12 = sphi %s428_s12, %s525_s12  }
   0x4   : > { %s453_s18 = sadd.s32 1, %s405_s15   ;;  %s91_s19 = sadd.s32 1, %s401_s14 }
   0x5   : > { %s88_s20 = ssub.s32 %s405_s15, %s453_s18  ;;  %p101_p0 = scmp.ne.s32.totalorder %s401_s14, %s397_s13 }
   0x6   : > { %p89_p1 = scmp.eq.s32.totalorder %s88_s20, 0  ;;  %p102_p2 = scmp.eq.s32.totalorder %s449_s16, 1 }
   0x7   : > { %p107_p3 = scmp.ne.s32.totalorder %s397_s13, %s393_s12  ;;  %p108_p4 = scmp.eq.s32.totalorder %s285_s17, 1 }
   0x8   : > { %s464_s21 = scalar_select %p89_p1, %s401_s14, %s91_s19  }
   0x9   : > { %p466_p5 = por %p102_p2, %p101_p0  ;;  %p470_p6 = por %p108_p4, %p107_p3 }
   0xa   : > { %p288_p7 = scmp.ge.s32.totalorder %s405_s15, 1  ;;  %p139_p8 = scmp.lt.s32.totalorder %s405_s15, 3 }
   0xc   : > { %p140_p9 = pnand %p288_p7, %p139_p8 }
   0xd   : > { %p162_p10 = scmp.lt.s32.totalorder (!%p140_p9), %s449_s16, 1  ;;  %s159_s6 = sand.u32 (!%p140_p9), 1, %s397_s13  }
   0xe   : > { %143 = sbr.rel (%p140_p9) target bundleno = 189 (0xbd), region = 32  ;;  %s289_s7 = sshll.u32 (!%p140_p9), %s159_s6, 3 }
   0xf   : > { %s293_s8 = sshll.u32 (!%p140_p9), %s449_s16, 3  ;;  %s161_s17 = scalar_lea.vmem (!%p140_p9), [#allocation2], %s289_s7 }
  0x10   : > { %s221_s11 = scalar_lea.hbm (!%p140_p9), %s522_s3, %s293_s8  ;;  %s223_s19 = sshll.u32 (!%p140_p9), %s161_s17, 4  ;;  %s224_s19 = int_to_ptr.vmem [resolvable:$true] %s223_s19 }
  0x11   : > { %s211_s20 = scalar_lea.sflag (!%p140_p9), [#allocation3], %s159_s6  ;;  %s363_s28 = scalar_lea.hbm (!%p140_p9), %s522_s3, 16 }
  0x13   : > { %v168_v0 = vld [vmem:[%s519_s0] sm:$0xff]  ;;  %v407_v1 = vmov 0   ;;  %s163_s26 = scalar_select %p162_p10, %s449_s16, 1 }
  0x14   : > { %336 = vset.pattern.permute.xlu0 %v407_v1  ;;  %v176_v2 = vld [vmem:[%s520_s1] sm:$0xff]  ;;  %s225_s16 = sshll.u32 %s221_s11, 4  ;;  %s226_s16 = int_to_ptr.hbm [resolvable:$true] %s225_s16 }
  0x15   : > { %171 = vperm.xlu0 %336, %v168_v0   ;;  %s290_s27 = sshll.u32 %s163_s26, 1  ;;  %s357_s24 = sshra.s32 %s226_s16, 4  ;;  %s358_s24 = int_to_ptr.hbm [resolvable:$true] %s357_s24 }
  0x16   : > { %s165_s30 = scalar_lea.vmem %s521_s2, %s290_s27  ;;  %s359_s25 = scalar_lea.hbm %s358_s24, 8 }
  0x17   : > { %v337_v4 = vld [vmem:[%s165_s30] ss:$0 sm:$0xff]  ;;  %v338_v5 = vld [vmem:[%s165_s30 + $0x1] ss:$0 sm:$0xff]  ;;  %p360_p11 = scmp.ne.s32.totalorder %s358_s24, %s359_s25  ;;  %p364_p0 = scmp.lt.s32.totalorder %s358_s24, %s522_s3 }
  0x18   : > { %p365_p1 = scmp.lt.s32.totalorder %s363_s28, %s359_s25 }
  0x19   : > { %p361_p12 = pnand %p360_p11, %p466_p5 }
  0x1a   : > { %p366_p2 = por %p365_p1, %p364_p0 }
  0x1b   : > { %p362_p13 = pneg %p361_p12 }
  0x1d   : > { %179 = vperm.xlu0 %336, %v176_v2   ;;  %p367_p3 = pnand %p366_p2, %p362_p13 }
  0x87   : > { %v172_v3 = vpop.permute.xlu0 %171 }
  0x88   : > { %v175_v7 = vmul.f32 %v337_v4, %v172_v3 }
  0x8f   : > { %v180_v6 = vpop.permute.xlu0 %179 }
  0x90   : > { %v183_v8 = vmul.f32 %v338_v5, %v180_v6 }
  0x92   : > { %v184_v9 = vadd.f32 %v183_v8, %v175_v7 }
  0x94   : > { %v185_v10 = vmul.f32 -0.02634, %v184_v9 }
  0x96   : > { %v186_v11 = vadd.f32 -0.006, %v185_v10 }
  0x98   : > { %v187_v12 = vmul.f32 1.442695, %v186_v11 }
  0x9a   : > { %339 = vpow2.f32 %v187_v12 }
  0xa0   : > { %v340_v13 = vpop.eup %339 }
  0xa1   : > { %v189_v14 = vmul.f32 0.9659258, %v340_v13  ;;  %v205_v22 = vsub.f32 1.0, %v340_v13 }
  0xa3   : > { %v190_v15 = vsub.f32 1.0, %v189_v14  ;;  %v206_v26 = vmul.f32 1.2940953, %v205_v22 }
  0xa5   : > { %341 = vrcp.f32 %v190_v15  ;;  %v202_v19 = vand.u32 2147483648, %v190_v15  ;;  %v200_v21 = vand.u32 2147483647, %v190_v15  ;;  %vm196_vm1 = vweird.f32 %v190_v15 }
  0xa7   : > { %v203_v24 = vor.u32 1.1754944e-38, %v202_v19  ;;  %vm201_vm3 = vcmp.eq.f32.partialorder %v200_v21, 8.507059e+37 }
  0xab   : > { %v342_v16 = vpop.eup %341 }
  0xac   : > { %v192_v17 = vmul.f32 %v342_v16, %v190_v15  ;;  %vm197_vm0 = vweird.f32 %v342_v16 }
  0xad   : > { %vm198_vm2 = vmor %vm196_vm1, %vm197_vm0 }
  0xae   : > { %v193_v18 = vsub.f32 1.0, %v192_v17 }
  0xb0   : > { %v194_v20 = vmul.f32 %v342_v16, %v193_v18 }
  0xb2   : > { %v195_v23 = vadd.f32 %v342_v16, %v194_v20 }
  0xb4   : > { %v199_v25 = vsel %vm198_vm2, %v342_v16, %v195_v23 }
  0xb5   : > { %v204_v27 = vsel %vm201_vm3, %v203_v24, %v199_v25 }
  0xb6   : > { %v207_v28 = vmul.f32 %v206_v26, %v204_v27 }
  0xb8   : > { %v291_v29 = vadd.f32 -0.19425, %v207_v28 }
  0xba   : > { %209 = vst [vmem:[%s161_s17] sm:$0xff] %v291_v29 }
  0xbb   : > { %370 = shalt.err (!%p367_p3)
}
  0xbc   : > { %296 = dma.vmem_to_hbm [thread:$0]  (%p466_p5), %s224_s19, 128, %s226_s16, %s211_s20  }
  0xbd PF: > { %p302_p4 = scmp.ge.s32.totalorder %s405_s15, 2  ;;  %s237_s4 = sand.u32 1, %s393_s12  }
  0xbe   : > { %s238_s5 = scalar_lea.sflag [#allocation3], %s237_s4 }
  0xbf   : > { %p299_p7 = pnand %p302_p4, %p470_p6 }
  0xc1   : > { %p300_p8 = pneg %p299_p7 }
  0xc3   : > { %388 = dma.done.wait (%p300_p8), %s238_s5, 128  }
  0xc4   : > { %390 = vsyncadd (%p300_p8), %s238_s5, 4294967168  ;;  %p13_p9 = scmp.ge.s32.totalorder %s453_s18, 4   ;;  %s525_s12 = smov %s397_s13 }
  0xc5   : > { %s526_s13 = smov %s401_s14  ;;  %s527_s14 = smov %s464_s21 }
  0xc6   : > { %s528_s15 = smov %s453_s18  ;;  %15 = sbr.rel (!%p13_p9) target bundleno = 3 (0x3), region = 67 }
  0xcb   :  { %244 = vsyncpa [#allocation3], 1 }
  0xcc   :  { %246 = vsyncpa [#allocation3 + $0x1], 1 }

</bundles_post_ra>
